<compile_context>
chip_gen: v7x
topology: tpu7x:2x2x1
jax: 0.10.0
libtpu: 0.0.40
codegen_flags: <defaults>
</compile_context>

<pallas_src>
import functools

import jax
import jax.numpy as jnp
from jax.experimental import pallas as pl
from jax.experimental.pallas import tpu as pltpu

EPS = 1e-8  # nn.CosineSimilarity default eps


# --------------------------------------------------------------------------
# Fused kernel: pairwise cosine similarity / temp on a 2D tile grid.
# --------------------------------------------------------------------------
def _similarity_kernel(x_ref, y_ref, o_ref, w1_sc, *,
                       temp_sq, eps_sq, negate, w1_every_step, matmul_dtype):
    # x-row squared norms, pre-scaled by temp^2 (folds 1/temp into the
    # rank-1 denominator factor -> epilogue is a single rsqrt-multiply).
    def compute_w1():
        xf = x_ref[...].astype(jnp.float32)
        w1_sc[...] = jnp.sum(xf * xf, axis=-1, keepdims=True) * temp_sq

    if w1_every_step:
        compute_w1()                                   # single i-block case
    else:
        pl.when(pl.program_id(1) == 0)(compute_w1)     # x block resident over j

    # y-row squared norms as a lane-dense (1, TN) row: ones(1,H) @ (y*y)^T on
    # the MXU gives the row directly in lane layout (no XLU relayout of a
    # (TN, 1) vector). Cost is ~1/TM of the main matmul.
    yf = y_ref[...].astype(jnp.float32)
    ones_row = jnp.ones((1, yf.shape[-1]), jnp.float32)
    w2_row = jax.lax.dot_general(
        ones_row, yf * yf,
        dimension_numbers=(((1,), (1,)), ((), ())),
        preferred_element_type=jnp.float32)            # (1, TN)

    # Pairwise dot products: contract the last dim of both operands on the MXU
    # (native transposed-RHS form -> no explicit y.T / XLU transpose).
    xa, ya = x_ref[...], y_ref[...]
    if matmul_dtype is not None and xa.dtype != matmul_dtype:
        xa = xa.astype(matmul_dtype)                   # opt-in bf16 path (v5e)
        ya = ya.astype(matmul_dtype)
    w12 = jax.lax.dot_general(
        xa, ya,
        dimension_numbers=(((1,), (1,)), ((), ())),
        preferred_element_type=jnp.float32)            # (TM, TN)
    if negate:                                         # temp < 0 (static)
        w12 = -w12

    # PyTorch ATen: denom = sqrt(clamp_min(w1 * w2, eps^2)); w1 and eps are
    # pre-scaled by temp^2, so this already includes the /temp.
    denom_sq = jnp.maximum(w1_sc[...] * w2_row, eps_sq)    # (TM,1)*(1,TN)
    o_ref[...] = (w12 * jax.lax.rsqrt(denom_sq)).astype(o_ref.dtype)


def _select_tiles(Bx, By, H, itemsize):
    """Pick (TM, TN) for max arithmetic intensity within a safe VMEM budget."""
    TN = 256 if By > 128 else 128
    if Bx <= 128:
        # Small batch: one lane-aligned tile; recompute w1 each step so both
        # grid axes stay "parallel" (v7x can shard the j axis).
        TM, w1_every_step = 128, True
    else:
        TM, w1_every_step = 1024, False
        # Keep >=2 i-blocks so v7x megacore can shard the parallel i axis.
        while TM > 128 and pl.cdiv(Bx, TM) < 2:
            TM //= 2

    def working_set(tm):
        return (2 * (tm + TN) * H * itemsize   # double-buffered x / y blocks
                + 2 * tm * TN * 4              # double-buffered f32 out block
                + (tm + TN) * H * 4            # f32 temporaries for the norms
                + tm * 4)                      # w1 scratch

    budget = 28 << 20                          # conservative (v7x has 64 MiB VMEM)
    while TM > 128 and working_set(TM) > budget:
        TM //= 2
    return TM, TN, w1_every_step, working_set(TM)


def similarity(x, y, temp, *, matmul_dtype=None):
    """Pallas equivalent of Similarity(temp)(x, y) for the SimCSE broadcast case.

    Supported inputs: x of shape (Bx, 1, H) and y of shape (1, By, H) (the
    standard SimCSE unsqueeze pattern), or plain (Bx, H) / (By, H) matrices.
    Returns the (Bx, By) matrix of cosine similarities divided by `temp`.
    """
    x2 = jnp.squeeze(x, axis=1) if x.ndim == 3 else x          # (Bx, H)
    y2 = jnp.squeeze(y, axis=0) if y.ndim == 3 else y          # (By, H)
    Bx, H = x2.shape
    By, Hy = y2.shape
    assert H == Hy, (H, Hy)
    temp_f = float(temp)
    assert temp_f != 0.0

    TM, TN, w1_every_step, ws = _select_tiles(Bx, By, H, x2.dtype.itemsize)
    grid = (pl.cdiv(Bx, TM), pl.cdiv(By, TN))                  # partial edge blocks OK

    # Right-sized scoped VMEM (working set already counts double buffering).
    vmem_limit = int(min(32 << 20, max(16 << 20, ws + (4 << 20))))

    temp_sq = temp_f * temp_f
    kernel = functools.partial(
        _similarity_kernel,
        temp_sq=temp_sq,
        eps_sq=(EPS * EPS) * temp_sq,
        negate=temp_f < 0.0,
        w1_every_step=w1_every_step,
        matmul_dtype=matmul_dtype,
    )

    # j carries the w1-scratch dependency unless we recompute it every step.
    dims = (("parallel", "parallel") if w1_every_step
            else ("parallel", "arbitrary"))

    return pl.pallas_call(
        kernel,
        out_shape=jax.ShapeDtypeStruct((Bx, By), jnp.float32),
        grid=grid,
        in_specs=[
            pl.BlockSpec((TM, H), lambda i, j: (i, 0)),
            pl.BlockSpec((TN, H), lambda i, j: (j, 0)),
        ],
        out_specs=pl.BlockSpec((TM, TN), lambda i, j: (i, j)),
        scratch_shapes=[pltpu.VMEM((TM, 1), jnp.float32)],
        compiler_params=pltpu.CompilerParams(
            dimension_semantics=dims,
            vmem_limit_bytes=vmem_limit,
        ),
    )(x2, y2)


def _reference(x, y, temp):
    # Pure-JAX reference mirroring nn.CosineSimilarity(dim=-1) with broadcasting.
    xb, yb = jnp.broadcast_arrays(x, y)
    w12 = jnp.sum(xb * yb, axis=-1)
    w1 = jnp.sum(xb * xb, axis=-1)
    w2 = jnp.sum(yb * yb, axis=-1)
    denom = jnp.sqrt(jnp.maximum(w1 * w2, EPS * EPS))
    return (w12 / denom) / temp


if __name__ == "__main__":
    # Deterministic setup. The module has no learned weights; its only
    # parameter is the temperature, fixed here.
    temp = 0.05

    key = jax.random.PRNGKey(0)
    kx, ky = jax.random.split(key)
    B, H = 8, 32
    x = jax.random.normal(kx, (B, 1, H), dtype=jnp.float32)   # x.unsqueeze(1)
    y = jax.random.normal(ky, (1, B, H), dtype=jnp.float32)   # y.unsqueeze(0)

    out = similarity(x, y, temp)
    out = jax.block_until_ready(out)

    ref = _reference(x, y, temp)
    assert out.shape == (B, B), out.shape
    assert jnp.allclose(out, ref, atol=1e-4, rtol=1e-4), (
        "mismatch vs reference: max abs err = %g"
        % float(jnp.max(jnp.abs(out - ref)))
    )

    print("KERNEL_OK")
</pallas_src>

<mosaic_0001>
module attributes {stable_mosaic.version = 11 : i64} {
  func.func @_similarity_kernel(%arg0: i32, %arg1: i32, %arg2: memref<128x32xf32, #tpu.memory_space<vmem>>, %arg3: memref<128x32xf32, #tpu.memory_space<vmem>>, %arg4: memref<128x128xf32, #tpu.memory_space<vmem>>, %arg5: memref<128x1xf32, #tpu.memory_space<vmem>>) attributes {dimension_semantics = [#tpu.dimension_semantics<parallel>, #tpu.dimension_semantics<parallel>], iteration_bounds = array<i64: 1, 1>, scalar_prefetch = 0 : i64, scratch_operands = 1 : i64, tpu.core_type = #tpu.core_type<tc>, window_params = [{transform_indices = @transform_0, window_bounds = array<i64: 128, 32>}, {transform_indices = @transform_1, window_bounds = array<i64: 128, 32>}, {transform_indices = @transform_2, window_bounds = array<i64: 128, 128>}]} {
    %c0 = arith.constant 0 : index
    %c0_0 = arith.constant 0 : index
    %0 = vector.load %arg2[%c0, %c0_0] : memref<128x32xf32, #tpu.memory_space<vmem>>, vector<128x32xf32>
    %1 = arith.mulf %0, %0 : vector<128x32xf32>
    %cst = arith.constant dense<0.000000e+00> : vector<128xf32>
    %2 = vector.multi_reduction <add>, %1, %cst [1] : vector<128x32xf32> to vector<128xf32>
    %3 = vector.shape_cast %2 : vector<128xf32> to vector<128x1xf32>
    %cst_1 = arith.constant 2.500000e-03 : f32
    %4 = vector.broadcast %cst_1 : f32 to vector<128x1xf32>
    %5 = arith.mulf %3, %4 : vector<128x1xf32>
    %c0_2 = arith.constant 0 : index
    %c0_3 = arith.constant 0 : index
    %6 = vector.load %arg5[%c0_2, %c0_3] : memref<128x1xf32, #tpu.memory_space<vmem>>, vector<128x1xf32>
    tpu.vector_store %arg5[%c0_2, %c0_3], %5 {strides = array<i32>} : memref<128x1xf32, #tpu.memory_space<vmem>>, vector<128x1xf32>,
    %c0_4 = arith.constant 0 : index
    %c0_5 = arith.constant 0 : index
    %7 = vector.load %arg3[%c0_4, %c0_5] : memref<128x32xf32, #tpu.memory_space<vmem>>, vector<128x32xf32>
    %cst_6 = arith.constant 1.000000e+00 : f32
    %8 = vector.broadcast %cst_6 : f32 to vector<1x32xf32>
    %9 = arith.mulf %7, %7 : vector<128x32xf32>
    %cst_7 = arith.constant dense<0.000000e+00> : vector<1x128xf32>
    %10 = tpu.matmul %8, %9, %cst_7 {dimension_numbers = #tpu.dot_dimension_numbers<[1], [1], [0], [0], [0, 0, 1, 0], [], []>} : vector<1x32xf32>, vector<128x32xf32>, vector<1x128xf32> -> vector<1x128xf32>
    %c0_8 = arith.constant 0 : index
    %c0_9 = arith.constant 0 : index
    %11 = vector.load %arg2[%c0_8, %c0_9] : memref<128x32xf32, #tpu.memory_space<vmem>>, vector<128x32xf32>
    %c0_10 = arith.constant 0 : index
    %c0_11 = arith.constant 0 : index
    %12 = vector.load %arg3[%c0_10, %c0_11] : memref<128x32xf32, #tpu.memory_space<vmem>>, vector<128x32xf32>
    %cst_12 = arith.constant dense<0.000000e+00> : vector<128x128xf32>
    %13 = tpu.matmul %11, %12, %cst_12 {dimension_numbers = #tpu.dot_dimension_numbers<[1], [1], [0], [0], [0, 0, 1, 0], [], []>} : vector<128x32xf32>, vector<128x32xf32>, vector<128x128xf32> -> vector<128x128xf32>
    %c0_13 = arith.constant 0 : index
    %c0_14 = arith.constant 0 : index
    %14 = vector.load %arg5[%c0_13, %c0_14] : memref<128x1xf32, #tpu.memory_space<vmem>>, vector<128x1xf32>
    %15 = vector.broadcast %14 : vector<128x1xf32> to vector<128x128xf32>
    %16 = vector.broadcast %10 : vector<1x128xf32> to vector<128x128xf32>
    %17 = arith.mulf %15, %16 : vector<128x128xf32>
    %cst_15 = arith.constant 2.500000e-19 : f32
    %18 = vector.broadcast %cst_15 : f32 to vector<128x128xf32>
    %19 = arith.maximumf %17, %18 : vector<128x128xf32>
    %20 = math.rsqrt %19 : vector<128x128xf32>
    %21 = arith.mulf %13, %20 : vector<128x128xf32>
    %c0_16 = arith.constant 0 : index
    %c0_17 = arith.constant 0 : index
    %22 = vector.load %arg4[%c0_16, %c0_17] : memref<128x128xf32, #tpu.memory_space<vmem>>, vector<128x128xf32>
    tpu.vector_store %arg4[%c0_16, %c0_17], %21 {strides = array<i32>} : memref<128x128xf32, #tpu.memory_space<vmem>>, vector<128x128xf32>,
    return
  }
  func.func @transform_0(%arg0: i32, %arg1: i32) -> (i32, i32) {
    %c0_i32 = arith.constant 0 : i32
    %c0_i32_0 = arith.constant 0 : i32
    return %arg0, %c0_i32 : i32, i32
  }
  func.func @transform_1(%arg0: i32, %arg1: i32) -> (i32, i32) {
    %c0_i32 = arith.constant 0 : i32
    %c0_i32_0 = arith.constant 0 : i32
    return %arg1, %c0_i32 : i32, i32
  }
  func.func @transform_2(%arg0: i32, %arg1: i32) -> (i32, i32) {
    %c0_i32 = arith.constant 0 : i32
    return %arg0, %arg1 : i32, i32
  }
}

</mosaic_0001>

<bundles_post_ra>
// kernel: tpu_custom_call.1
= control target key start
LH: loop header
LB: loop body
LE: loop exit
PB: predicated region body
PF: predicated region fallthrough
CT: control target
= control target key end

     0   :  { %7 = vsyncpa [#allocation4], 0  ;;  %s1445_s0 = inlined_call_operand.hbm [shape: f32[8,32], index: 0, kind: input, shape index: {}]   ;;  %s1446_s1 = inlined_call_operand.hbm [shape: f32[8,32], index: 1, kind: input, shape index: {}]   ;;  %s1447_s2 = inlined_call_operand.hbm [shape: f32[8,8], index: 2, kind: output, shape index: {}]  }
   0x1   :  { %8 = vsyncpa [#allocation7], 0 }
   0x2   :  { %9 = vsyncpa [#allocation5], 0 }
   0x3   :  { %14 = vsyncadd [#allocation4], 1920  ;;  %s1147_s9 = smov [#allocation3]   ;;  %s1075_s13 = scalar_lea.hbm %s1445_s0, 128 }
   0x4   :  { %s15_s10 = sshll.u32 %s1147_s9, 4  ;;  %p1076_p0 = scmp.ne.s32.totalorder %s1445_s0, %s1075_s13  ;;  %s16_s10 = int_to_ptr.vmem [resolvable:$true] %s15_s10 }
   0x5   :  { %p1079_p1 = scmp.lt.u32.totalorder %s1075_s13, %s1445_s0 }
   0x7   :  { %p1081_p2 = pnand %p1079_p1, %p1076_p0 }
   0x9   :  { %1084 = shalt.err (!%p1081_p2)
}
   0xa   :  { %s1085_s18 = scalar_lea.vmem %s16_s10, 128  ;;  %s1089_s19 = scalar_lea.vmem %s16_s10, 2048 }
   0xb   :  { %p1086_p3 = scmp.ne.s32.totalorder %s16_s10, %s1085_s18  ;;  %p1090_p4 = scmp.lt.s32.totalorder %s16_s10, %s16_s10 }
   0xc   :  { %p1091_p5 = scmp.lt.s32.totalorder %s1089_s19, %s1085_s18 }
   0xe   :  { %p1092_p6 = por %p1091_p5, %p1090_p4 }
  0x10   :  { %p1093_p7 = pnand %p1092_p6, %p1086_p3 }
  0x12   :  { %1096 = shalt.err (!%p1093_p7)
}
  0x13   :  { %s1148_s20 = smov 128   ;;  %s1149_s21 = smov 8  }
  0x14   :  { %21 = dma.hbm_to_vmem [thread:$0]  %s1445_s0, 128, %s16_s10, [#allocation4], %s1148_s20, %s1148_s20, %s1149_s21  }
  0x15   :  { %26 = vsyncadd [#allocation7], 1920  ;;  %s1150_s24 = smov [#allocation6]   ;;  %s1097_s28 = scalar_lea.hbm %s1446_s1, 128 }
  0x16   :  { %s27_s25 = sshll.u32 %s1150_s24, 4  ;;  %p1098_p8 = scmp.ne.s32.totalorder %s1446_s1, %s1097_s28  ;;  %s28_s25 = int_to_ptr.vmem [resolvable:$true] %s27_s25 }
  0x17   :  { %p1101_p9 = scmp.lt.u32.totalorder %s1097_s28, %s1446_s1 }
  0x19   :  { %p1103_p10 = pnand %p1101_p9, %p1098_p8 }
  0x1b   :  { %1106 = shalt.err (!%p1103_p10)
}
  0x1c   :  { %s1107_s5 = scalar_lea.vmem %s28_s25, 128  ;;  %s1111_s0 = scalar_lea.vmem %s28_s25, 2048 }
  0x1d   :  { %p1108_p11 = scmp.ne.s32.totalorder %s28_s25, %s1107_s5  ;;  %p1112_p12 = scmp.lt.s32.totalorder %s28_s25, %s28_s25 }
  0x1e   :  { %p1113_p13 = scmp.lt.s32.totalorder %s1111_s0, %s1107_s5 }
  0x20   :  { %p1114_p0 = por %p1113_p13, %p1112_p12 }
  0x22   :  { %p1115_p1 = pnand %p1114_p0, %p1108_p11 }
  0x24   :  { %1118 = shalt.err (!%p1115_p1)
}
  0x25   :  { %33 = dma.hbm_to_vmem [thread:$0]  %s1446_s1, 128, %s28_s25, [#allocation7], %s1148_s20, %s1148_s20, %s1149_s21  }
  0x26   :  { %1141 = dma.done.wait [#allocation4], 2048  }
  0x27   :  { %1142 = vsyncadd [#allocation4], 4294965248 }
  0x28   :  { %1143 = dma.done.wait [#allocation7], 2048  }
  0x29   :  { %1144 = vsyncadd [#allocation7], 4294965248  ;;  %v1151_v0 = vmov 0.0|0.0   ;;  %vm1152_vm0 = vmmov 0   ;;  %v1153_v1 = vmov 0.0   ;;  %v1203_v2 = vld [vmem:[#allocation3 + $0x10] sm:$0xff] }
  0x2a   :  { %951 = vmatprep.subr.bf16.mxu0 %v1151_v0  ;;  %892 = vmatprep.mubr.msk.f32.mxu0 %vm1152_vm0, %v1153_v1  ;;  %vm72_vm1 = vcmask 261120   ;;  %v40_v3 = vld [vmem:[#allocation3] sm:$0xff]  ;;  %v58_v5 = vmul.f32 %v1203_v2, %v1203_v2  ;;  %v155_v7 = vld [vmem:[#allocation6 + $0x8] sm:$0xff]  ;;  %v1207_v9 = vld [vmem:[#allocation3 + $0x18] sm:$0xff]  ;;  %vm137_vm3 = vcmask 7168  }
  0x2b   :  { %v154_v4 = vld [vmem:[#allocation6] sm:$0xff]  ;;  %v56_v6 = vmul.f32 %v40_v3, %v40_v3  ;;  %v1209_v10 = vld [vmem:[#allocation3 + $0x8] sm:$0xff]  ;;  %927 = vmatprep.mubr.msk.f32.mxu1 %vm72_vm1, %v40_v3  ;;  %v171_v11 = vmul.f32 %v155_v7, %v155_v7  ;;  %vm1214_vm2 = vmpackc.low %vm72_vm1, %vm72_vm1  ;;  %v59_v13 = vmul.f32 %v1207_v9, %v1207_v9 }
  0x2c   :  { %v170_v8 = vmul.f32 %v154_v4, %v154_v4  ;;  %v57_v14 = vmul.f32 %v1209_v10, %v1209_v10  ;;  %v1222_v15 = vld [vmem:[#allocation3 + $0x28] sm:$0xff]  ;;  %v983_v16 = vpack.c.bf16 %v155_v7, %v154_v4  ;;  %v79_v17 = vsel %vm72_vm1, %v58_v5, 0.0  ;;  %v156_v19 = vld [vmem:[#allocation6 + $0x10] sm:$0xff]  ;;  %v157_v20 = vld [vmem:[#allocation6 + $0x18] sm:$0xff] }
  0x2d   :  { %v73_v18 = vsel %vm72_vm1, %v56_v6, 0.0  ;;  %v1226_v21 = vld [vmem:[#allocation3 + $0x20] sm:$0xff]  ;;  %80 = vadd.xlane.f32.xlu1 %v79_v17  ;;  %v61_v23 = vmul.f32 %v1222_v15, %v1222_v15  ;;  %v82_v24 = vsel %vm72_vm1, %v59_v13, 0.0  ;;  %v172_v27 = vmul.f32 %v156_v19, %v156_v19  ;;  %v1238_v29 = vld [vmem:[#allocation3 + $0x38] sm:$0xff]  ;;  %v1242_v30 = vld [vmem:[#allocation3 + $0x30] sm:$0xff] }
  0x2e   :  { %74 = vadd.xlane.f32.xlu0 %v73_v18  ;;  %v952_v22 = vpack.c.bf16 %v171_v11, %v170_v8  ;;  %v76_v25 = vsel %vm72_vm1, %v57_v14, 0.0  ;;  %v60_v26 = vmul.f32 %v1226_v21, %v1226_v21  ;;  %985 = vmatprep.subr.msk.bf16.mxu1 %vm1214_vm2, %v983_v16  ;;  %v173_v28 = vmul.f32 %v157_v20, %v157_v20  ;;  %v1248_v33 = vld [vmem:[#allocation3 + $0x48] sm:$0xff]  ;;  %v158_v38 = vld [vmem:[#allocation6 + $0x20] sm:$0xff]  ;;  %v1265_v48 = vld [vmem:[#allocation3 + $0x58] sm:$0xff] }
  0x2f   :  { %988 = vmatpush3.bf16.xpose.msk.msra.mxu1 %vm1214_vm2, %v983_v16  ;;  %v88_v31 = vsel %vm72_vm1, %v61_v23, 0.0  ;;  %v63_v32 = vmul.f32 %v1238_v29, %v1238_v29  ;;  %v62_v35 = vmul.f32 %v1242_v30, %v1242_v30  ;;  %v989_v36 = vpack.c.bf16 %v157_v20, %v156_v19  ;;  %v159_v39 = vld [vmem:[#allocation6 + $0x28] sm:$0xff]  ;;  %v1253_v40 = vld [vmem:[#allocation3 + $0x40] sm:$0xff]  ;;  %v1269_v49 = vld [vmem:[#allocation3 + $0x50] sm:$0xff] }
  0x30   :  { %954 = vmatpush3.bf16.xpose.msk.msra.mxu0 %vm1214_vm2, %v952_v22  ;;  %v85_v34 = vsel %vm72_vm1, %v60_v26, 0.0  ;;  %v956_v37 = vpack.c.bf16 %v173_v28, %v172_v27  ;;  %v995_v41 = vpack.c.bf16 %v159_v39, %v158_v38  ;;  %v65_v43 = vmul.f32 %v1248_v33, %v1248_v33  ;;  %v1277_v52 = vld [vmem:[#allocation3 + $0x68] sm:$0xff]  ;;  %v160_v56 = vld [vmem:[#allocation6 + $0x30] sm:$0xff]  ;;  %v161_v57 = vld [vmem:[#allocation6 + $0x38] sm:$0xff] }
  0x31   :  { %955 = vmatprep.subr.bf16.mxu0 %v1151_v0  ;;  %83 = vadd.xlane.f32.xlu1 %v82_v24  ;;  %v94_v42 = vsel %vm72_vm1, %v63_v32, 0.0  ;;  %v91_v44 = vsel %vm72_vm1, %v62_v35, 0.0  ;;  %v64_v45 = vmul.f32 %v1253_v40, %v1253_v40  ;;  %v174_v46 = vmul.f32 %v158_v38, %v158_v38  ;;  %v1282_v58 = vld [vmem:[#allocation3 + $0x60] sm:$0xff]  ;;  %v1292_v4 = vld [vmem:[#allocation3 + $0x78] sm:$0xff]  ;;  %v1296_v5 = vld [vmem:[#allocation3 + $0x70] sm:$0xff] }
  0x32   :  { %77 = vadd.xlane.f32.xlu0 %v76_v25  ;;  %991 = vmatprep.subr.msk.bf16.mxu1 %vm1214_vm2, %v989_v36  ;;  %v175_v47 = vmul.f32 %v159_v39, %v159_v39  ;;  %v100_v50 = vsel %vm72_vm1, %v65_v43, 0.0  ;;  %v67_v51 = vmul.f32 %v1265_v48, %v1265_v48  ;;  %v66_v54 = vmul.f32 %v1269_v49, %v1269_v49  ;;  %v162_v14 = vld [vmem:[#allocation6 + $0x40] sm:$0xff]  ;;  %v163_v16 = vld [vmem:[#allocation6 + $0x48] sm:$0xff]  ;;  %v164_v25 = vld [vmem:[#allocation6 + $0x50] sm:$0xff] }
  0x33   :  { %v97_v53 = vsel %vm72_vm1, %v64_v45, 0.0  ;;  %v1001_v59 = vpack.c.bf16 %v161_v57, %v160_v56  ;;  %v69_v61 = vmul.f32 %v1277_v52, %v1277_v52  ;;  %v68_v63 = vmul.f32 %v1282_v58, %v1282_v58  ;;  %v165_v26 = vld [vmem:[#allocation6 + $0x58] sm:$0xff]  ;;  %v167_v35 = vld [vmem:[#allocation6 + $0x68] sm:$0xff] }
  0x34   :  { %v960_v55 = vpack.c.bf16 %v175_v47, %v174_v46  ;;  %v106_v60 = vsel %vm72_vm1, %v67_v51, 0.0  ;;  %v103_v62 = vsel %vm72_vm1, %v66_v54, 0.0  ;;  %v176_v1 = vmul.f32 %v160_v56, %v160_v56 }
  0x35   :  { %89 = vadd.xlane.f32.xlu1 %v88_v31  ;;  %v177_v3 = vmul.f32 %v161_v57, %v161_v57  ;;  %v112_v6 = vsel %vm72_vm1, %v69_v61, 0.0  ;;  %v71_v7 = vmul.f32 %v1292_v4, %v1292_v4  ;;  %v109_v8 = vsel %vm72_vm1, %v68_v63, 0.0 }
  0x36   :  { %86 = vadd.xlane.f32.xlu0 %v85_v34  ;;  %v70_v11 = vmul.f32 %v1296_v5, %v1296_v5  ;;  %v1007_v17 = vpack.c.bf16 %v163_v16, %v162_v14  ;;  %v1154_v18 = vmov 0   ;;  %v178_v22 = vmul.f32 %v162_v14, %v162_v14  ;;  %v166_v34 = vld [vmem:[#allocation6 + $0x60] sm:$0xff] }
  0x37   :  { %994 = vmatpush3.bf16.xpose.msk.msra.mxu1 %vm1214_vm2, %v989_v36  ;;  %v964_v13 = vpack.c.bf16 %v177_v3, %v176_v1  ;;  %1041 = vset.pattern.permute.xlu0 %v1154_v18  ;;  %v118_v19 = vsel %vm72_vm1, %v71_v7, 0.0  ;;  %v179_v23 = vmul.f32 %v163_v16, %v163_v16  ;;  %v1013_v27 = vpack.c.bf16 %v165_v26, %v164_v25 }
  0x38   :  { %958 = vmatpush3.bf16.xpose.msk.msra.mxu0 %vm1214_vm2, %v956_v37  ;;  %997 = vmatprep.subr.msk.bf16.mxu1 %vm1214_vm2, %v995_v41  ;;  %v115_v20 = vsel %vm72_vm1, %v70_v11, 0.0  ;;  %v180_v28 = vmul.f32 %v164_v25, %v164_v25  ;;  %v181_v31 = vmul.f32 %v165_v26, %v165_v26  ;;  %v1019_v36 = vpack.c.bf16 %v167_v35, %v166_v34 }
  0x39   :  { %959 = vmatprep.subr.bf16.mxu0 %v1151_v0  ;;  %95 = vadd.xlane.f32.xlu1 %v94_v42  ;;  %v968_v24 = vpack.c.bf16 %v179_v23, %v178_v22  ;;  %v182_v37 = vmul.f32 %v166_v34, %v166_v34  ;;  %v183_v38 = vmul.f32 %v167_v35, %v167_v35  ;;  %v169_v42 = vld [vmem:[#allocation6 + $0x78] sm:$0xff]  ;;  %v1155_v47 = vmov 1.0  }
  0x3a   :  { %92 = vadd.xlane.f32.xlu0 %v91_v44  ;;  %1042 = vset.pattern.permute.xlu1 %v1154_v18  ;;  %v972_v32 = vpack.c.bf16 %v181_v31, %v180_v28  ;;  %v185_v45 = vmul.f32 %v169_v42, %v169_v42  ;;  %v660_v28 = vlaneseq }
  0x3b   :  { %v976_v39 = vpack.c.bf16 %v183_v38, %v182_v37 }
  0x3c   :  { %v661_v31 = vshrl.u32 %v660_v28, 7 }
  0x3d   :  { %101 = vadd.xlane.f32.xlu1 %v100_v50 }
  0x3e   :  { %98 = vadd.xlane.f32.xlu0 %v97_v53 }
  0x3f   :  { %1000 = vmatpush3.bf16.xpose.msk.msra.mxu1 %vm1214_vm2, %v995_v41  ;;  %v168_v41 = vld [vmem:[#allocation6 + $0x70] sm:$0xff] }
  0x40   :  { %962 = vmatpush3.bf16.xpose.msk.msra.mxu0 %vm1214_vm2, %v960_v55  ;;  %1003 = vmatprep.subr.msk.bf16.mxu1 %vm1214_vm2, %v1001_v59  ;;  %v1025_v43 = vpack.c.bf16 %v169_v42, %v168_v41  ;;  %v184_v44 = vmul.f32 %v168_v41, %v168_v41 }
  0x41   :  { %963 = vmatprep.subr.bf16.mxu0 %v1151_v0  ;;  %107 = vadd.xlane.f32.xlu1 %v106_v60 }
  0x42   :  { %104 = vadd.xlane.f32.xlu0 %v103_v62  ;;  %v980_v46 = vpack.c.bf16 %v185_v45, %v184_v44 }
  0x45   :  { %113 = vadd.xlane.f32.xlu1 %v112_v6 }
  0x46   :  { %110 = vadd.xlane.f32.xlu0 %v109_v8 }
  0x47   :  { %1006 = vmatpush3.bf16.xpose.msk.msra.mxu1 %vm1214_vm2, %v1001_v59 }
  0x48   :  { %966 = vmatpush3.bf16.xpose.msk.msra.mxu0 %vm1214_vm2, %v964_v13  ;;  %1009 = vmatprep.subr.msk.bf16.mxu1 %vm1214_vm2, %v1007_v17 }
  0x49   :  { %967 = vmatprep.subr.bf16.mxu0 %v1151_v0  ;;  %119 = vadd.xlane.f32.xlu1 %v118_v19 }
  0x4a   :  { %116 = vadd.xlane.f32.xlu0 %v115_v20 }
  0x4f   :  { %1012 = vmatpush3.bf16.xpose.msk.msra.mxu1 %vm1214_vm2, %v1007_v17 }
  0x50   :  { %970 = vmatpush3.bf16.xpose.msk.msra.mxu0 %vm1214_vm2, %v968_v24  ;;  %1015 = vmatprep.subr.msk.bf16.mxu1 %vm1214_vm2, %v1013_v27 }
  0x51   :  { %971 = vmatprep.subr.bf16.mxu0 %v1151_v0 }
  0x57   :  { %1018 = vmatpush3.bf16.xpose.msk.msra.mxu1 %vm1214_vm2, %v1013_v27 }
  0x58   :  { %974 = vmatpush3.bf16.xpose.msk.msra.mxu0 %vm1214_vm2, %v972_v32  ;;  %1021 = vmatprep.subr.msk.bf16.mxu1 %vm1214_vm2, %v1019_v36  ;;  %v662_v32 = vsub.s32 0, %v661_v31 }
  0x59   :  { %975 = vmatprep.subr.bf16.mxu0 %v1151_v0 }
  0x5f   :  { %1024 = vmatpush3.bf16.xpose.msk.msra.mxu1 %vm1214_vm2, %v1019_v36 }
  0x60   :  { %978 = vmatpush3.bf16.xpose.msk.msra.mxu0 %vm1214_vm2, %v976_v39  ;;  %1027 = vmatprep.subr.msk.bf16.mxu1 %vm1214_vm2, %v1025_v43 }
  0x61   :  { %979 = vmatprep.subr.bf16.mxu0 %v1151_v0 }
  0x67   :  { %1030 = vmatpush3.bf16.xpose.msk.msra.mxu1 %vm1214_vm2, %v1025_v43 }
  0x68   :  { %982 = vmatpush3.bf16.xpose.msk.msra.mxu0 %vm1214_vm2, %v980_v46 }
  0x6e   :  { %928 = vmatmul.mubr.msk.f32.vlgmr.msra.gmra.mrb[0].mxu1 %vm72_vm1, %v1209_v10 }
  0x6f   :  { %893 = vmatmul.mubr.msk.f32.vlgmr.msra.gmra.mrb[0].mxu0 %vm72_vm1, %v1155_v47  ;;  %930 = vmatprep.mubr.msk.f32.mxu1 %vm72_vm1, %v1203_v2 }
  0x72   :  { %931 = vmatmul.mubr.msk.f32.gmra.mrb[2].mxu1 %vm72_vm1, %v1207_v9 }
  0x73   :  { %933 = vmatprep.mubr.msk.f32.mxu1 %vm72_vm1, %v1226_v21 }
  0x76   :  { %934 = vmatmul.mubr.msk.f32.gmra.mrb[4].mxu1 %vm72_vm1, %v1222_v15 }
  0x77   :  { %936 = vmatprep.mubr.msk.f32.mxu1 %vm72_vm1, %v1242_v30 }
  0x7a   :  { %937 = vmatmul.mubr.msk.f32.gmra.mrb[6].mxu1 %vm72_vm1, %v1238_v29 }
  0x7b   :  { %939 = vmatprep.mubr.msk.f32.mxu1 %vm72_vm1, %v1253_v40 }
  0x7e   :  { %940 = vmatmul.mubr.msk.f32.gmra.mrb[8].mxu1 %vm72_vm1, %v1248_v33 }
  0x7f   :  { %942 = vmatprep.mubr.msk.f32.mxu1 %vm72_vm1, %v1269_v49 }
  0x82   :  { %943 = vmatmul.mubr.msk.f32.gmra.mrb[10].mxu1 %vm72_vm1, %v1265_v48 }
  0x83   :  { %945 = vmatprep.mubr.msk.f32.mxu1 %vm72_vm1, %v1282_v58 }
  0x86   :  { %946 = vmatmul.mubr.msk.f32.gmra.mrb[12].mxu1 %vm72_vm1, %v1277_v52 }
  0x87   :  { %948 = vmatprep.mubr.msk.f32.mxu1 %vm72_vm1, %v1296_v5 }
  0x8a   :  { %949 = vmatmul.mubr.msk.f32.gmra.mrb[14].mxu1 %vm72_vm1, %v1292_v4 }
  0xba   :  { %v81_v0 = vpop.xlane.xlu1 %80 }
  0xbb   :  { %v75_v2 = vpop.xlane.xlu0 %74  ;;  %v123_v9 = vmul.f32 0.0025, %v81_v0 }
  0xbc   :  { %v121_v10 = vmul.f32 0.0025, %v75_v2 }
  0xbd   :  { %140 = vst.msk [vmem:[#allocation2 + $0x10] sm:$0xff] %vm137_vm3, %v123_v9 }
  0xbe   :  { %138 = vst.msk [vmem:[#allocation2] sm:$0xff] %vm137_vm3, %v121_v10  ;;  %v84_v12 = vpop.xlane.xlu1 %83 }
  0xbf   :  { %v78_v15 = vpop.xlane.xlu0 %77  ;;  %v124_v21 = vmul.f32 0.0025, %v84_v12 }
  0xc0   :  { %v122_v29 = vmul.f32 0.0025, %v78_v15 }
  0xc1   :  { %141 = vst.msk [vmem:[#allocation2 + $0x18] sm:$0xff] %vm137_vm3, %v124_v21 }
  0xc2   :  { %139 = vst.msk [vmem:[#allocation2 + $0x8] sm:$0xff] %vm137_vm3, %v122_v29  ;;  %v90_v30 = vpop.xlane.xlu1 %89 }
  0xc3   :  { %v87_v33 = vpop.xlane.xlu0 %86  ;;  %v126_v40 = vmul.f32 0.0025, %v90_v30 }
  0xc4   :  { %v125_v48 = vmul.f32 0.0025, %v87_v33  ;;  %v566_v56 = vld [vmem:[#allocation2 + $0x10] sm:$0xff] }
  0xc5   :  { %v564_v49 = vld [vmem:[#allocation2] sm:$0xff]  ;;  %143 = vst.msk [vmem:[#allocation2 + $0x28] sm:$0xff] %vm137_vm3, %v126_v40 }
  0xc6   :  { %582 = vperm.xlu0 %1041, %v564_v49   ;;  %142 = vst.msk [vmem:[#allocation2 + $0x20] sm:$0xff] %vm137_vm3, %v125_v48  ;;  %v96_v50 = vpop.xlane.xlu1 %95 }
  0xc7   :  { %v93_v51 = vpop.xlane.xlu0 %92  ;;  %v128_v52 = vmul.f32 0.0025, %v96_v50 }
  0xc8   :  { %v127_v53 = vmul.f32 0.0025, %v93_v51  ;;  %v567_v61 = vld [vmem:[#allocation2 + $0x18] sm:$0xff] }
  0xc9   :  { %v565_v54 = vld [vmem:[#allocation2 + $0x8] sm:$0xff]  ;;  %145 = vst.msk [vmem:[#allocation2 + $0x38] sm:$0xff] %vm137_vm3, %v128_v52 }
  0xca   :  { %587 = vperm.xlu1 %1042, %v565_v54   ;;  %144 = vst.msk [vmem:[#allocation2 + $0x30] sm:$0xff] %vm137_vm3, %v127_v53  ;;  %v102_v55 = vpop.xlane.xlu1 %101 }
  0xcb   :  { %v99_v57 = vpop.xlane.xlu0 %98  ;;  %v130_v58 = vmul.f32 0.0025, %v102_v55 }
  0xcc   :  { %v129_v59 = vmul.f32 0.0025, %v99_v57  ;;  %v569_v13 = vld [vmem:[#allocation2 + $0x28] sm:$0xff] }
  0xcd   :  { %147 = vst.msk [vmem:[#allocation2 + $0x48] sm:$0xff] %vm137_vm3, %v130_v58  ;;  %v568_v4 = vld [vmem:[#allocation2 + $0x20] sm:$0xff] }
  0xce   :  { %592 = vperm.xlu1 %1042, %v566_v56   ;;  %146 = vst.msk [vmem:[#allocation2 + $0x40] sm:$0xff] %vm137_vm3, %v129_v59  ;;  %v108_v60 = vpop.xlane.xlu1 %107 }
  0xcf   :  { %v105_v62 = vpop.xlane.xlu0 %104  ;;  %v132_v63 = vmul.f32 0.0025, %v108_v60 }
  0xd0   :  { %v131_v1 = vmul.f32 0.0025, %v105_v62  ;;  %v571_v22 = vld [vmem:[#allocation2 + $0x38] sm:$0xff] }
  0xd1   :  { %149 = vst.msk [vmem:[#allocation2 + $0x58] sm:$0xff] %vm137_vm3, %v132_v63  ;;  %v570_v19 = vld [vmem:[#allocation2 + $0x30] sm:$0xff] }
  0xd2   :  { %597 = vperm.xlu1 %1042, %v567_v61   ;;  %148 = vst.msk [vmem:[#allocation2 + $0x50] sm:$0xff] %vm137_vm3, %v131_v1  ;;  %v114_v3 = vpop.xlane.xlu1 %113 }
  0xd3   :  { %v111_v5 = vpop.xlane.xlu0 %110  ;;  %v134_v6 = vmul.f32 0.0025, %v114_v3 }
  0xd4   :  { %v133_v7 = vmul.f32 0.0025, %v111_v5  ;;  %v573_v8 = vld [vmem:[#allocation2 + $0x48] sm:$0xff] }
  0xd5   :  { %151 = vst.msk [vmem:[#allocation2 + $0x68] sm:$0xff] %vm137_vm3, %v134_v6  ;;  %627 = vperm.xlu0 %1041, %v573_v8   ;;  %v572_v24 = vld [vmem:[#allocation2 + $0x40] sm:$0xff] }
  0xd6   :  { %602 = vperm.xlu1 %1042, %v568_v4   ;;  %150 = vst.msk [vmem:[#allocation2 + $0x60] sm:$0xff] %vm137_vm3, %v133_v7  ;;  %v120_v11 = vpop.xlane.xlu1 %119 }
  0xd7   :  { %v117_v14 = vpop.xlane.xlu0 %116  ;;  %v136_v16 = vmul.f32 0.0025, %v120_v11 }
  0xd8   :  { %v135_v17 = vmul.f32 0.0025, %v117_v14  ;;  %v575_v18 = vld [vmem:[#allocation2 + $0x58] sm:$0xff] }
  0xd9   :  { %153 = vst.msk [vmem:[#allocation2 + $0x78] sm:$0xff] %vm137_vm3, %v136_v16  ;;  %637 = vperm.xlu0 %1041, %v575_v18   ;;  %v574_v25 = vld [vmem:[#allocation2 + $0x50] sm:$0xff] }
  0xda   :  { %607 = vperm.xlu1 %1042, %v569_v13   ;;  %152 = vst.msk [vmem:[#allocation2 + $0x70] sm:$0xff] %vm137_vm3, %v135_v17 }
  0xdc   :  { %v577_v20 = vld [vmem:[#allocation2 + $0x68] sm:$0xff] }
  0xdd   :  { %647 = vperm.xlu0 %1041, %v577_v20   ;;  %v576_v26 = vld [vmem:[#allocation2 + $0x60] sm:$0xff] }
  0xde   :  { %612 = vperm.xlu1 %1042, %v570_v19  }
  0xe0   :  { %v579_v23 = vld [vmem:[#allocation2 + $0x78] sm:$0xff] }
  0xe1   :  { %657 = vperm.xlu0 %1041, %v579_v23   ;;  %v578_v27 = vld [vmem:[#allocation2 + $0x70] sm:$0xff] }
  0xe2   :  { %617 = vperm.xlu1 %1042, %v571_v22  }
  0xe6   :  { %622 = vperm.xlu1 %1042, %v572_v24  }
  0xea   :  { %632 = vperm.xlu1 %1042, %v574_v25  }
  0xee   :  { %642 = vperm.xlu1 %1042, %v576_v26  }
  0xf2   :  { %652 = vperm.xlu1 %1042, %v578_v27  }
 0x141   :  { %v929_v35 = vpop.f32.mrb[0].mxu1 }
 0x142   :  { %v303_v34 = vpop.f32.mrb[0].mxu0  ;;  %v485_v37 = vpop.f32.mrb[1].mxu1 }
 0x143   :  { %v1388_v36 = vrot.slane %v303_v34, %v662_v32  ;;  %v894_v38 = vpop.f32.mrb[1].mxu0 }
 0x145   :  { %v583_v39 = vpop.permute.xlu0 %582  ;;  %v932_v42 = vpop.f32.mrb[2].mxu1 }
 0x146   :  { %v664_v41 = vmul.f32 %v1388_v36, %v583_v39  ;;  %v495_v43 = vpop.f32.mrb[3].mxu1 }
 0x148   :  { %v680_v44 = vmax.f32 %v664_v41, 2.5e-19 }
 0x149   :  { %v588_v45 = vpop.permute.xlu1 %587  ;;  %v1392_v47 = vpop.f32.mrb[4].mxu1 }
 0x14a   :  { %1043 = vrsqrt.f32 %v680_v44  ;;  %v665_v46 = vmul.f32 %v1388_v36, %v588_v45  ;;  %v1394_v0 = vpop.f32.mrb[5].mxu1 }
 0x14c   :  { %v681_v2 = vmax.f32 %v665_v46, 2.5e-19 }
 0x14d   :  { %v593_v9 = vpop.permute.xlu1 %592  ;;  %v1397_v12 = vpop.f32.mrb[6].mxu1 }
 0x14e   :  { %1045 = vrsqrt.f32 %v681_v2  ;;  %v666_v10 = vmul.f32 %v1388_v36, %v593_v9  ;;  %v1399_v15 = vpop.f32.mrb[7].mxu1 }
 0x150   :  { %v682_v21 = vmax.f32 %v666_v10, 2.5e-19 }
 0x151   :  { %v598_v29 = vpop.permute.xlu1 %597  ;;  %v941_v33 = vpop.f32.mrb[8].mxu1 }
 0x152   :  { %1047 = vrsqrt.f32 %v682_v21  ;;  %v667_v30 = vmul.f32 %v1388_v36, %v598_v29  ;;  %v1402_v40 = vpop.f32.mrb[9].mxu1 }
 0x154   :  { %v1044_v48 = vpop.eup %1043  ;;  %v683_v49 = vmax.f32 %v667_v30, 2.5e-19  ;;  %v628_v52 = vpop.permute.xlu0 %627 }
 0x155   :  { %v712_v50 = vmul.f32 %v1044_v48, %v485_v37  ;;  %v603_v51 = vpop.permute.xlu1 %602  ;;  %v673_v54 = vmul.f32 %v1388_v36, %v628_v52  ;;  %v944_v55 = vpop.f32.mrb[10].mxu1 }
 0x156   :  { %1049 = vrsqrt.f32 %v683_v49  ;;  %v668_v53 = vmul.f32 %v1388_v36, %v603_v51  ;;  %v1406_v56 = vpop.f32.mrb[11].mxu1 }
 0x157   :  { %728 = vst [vmem:[#allocation8] sm:$0xff] %v712_v50  ;;  %v689_v59 = vmax.f32 %v673_v54, 2.5e-19 }
 0x158   :  { %v1046_v57 = vpop.eup %1045  ;;  %v684_v58 = vmax.f32 %v668_v53, 2.5e-19  ;;  %v638_v62 = vpop.permute.xlu0 %637 }
 0x159   :  { %v713_v60 = vmul.f32 %v1046_v57, %v929_v35  ;;  %v608_v61 = vpop.permute.xlu1 %607  ;;  %v675_v1 = vmul.f32 %v1388_v36, %v638_v62  ;;  %v947_v3 = vpop.f32.mrb[12].mxu1 }
 0x15a   :  { %1051 = vrsqrt.f32 %v684_v58  ;;  %v669_v63 = vmul.f32 %v1388_v36, %v608_v61  ;;  %v1410_v4 = vpop.f32.mrb[13].mxu1 }
 0x15b   :  { %729 = vst [vmem:[#allocation8 + $0x8] sm:$0xff] %v713_v60  ;;  %1053 = vrsqrt.f32 %v689_v59  ;;  %v691_v7 = vmax.f32 %v675_v1, 2.5e-19 }
 0x15c   :  { %v1048_v5 = vpop.eup %1047  ;;  %v685_v6 = vmax.f32 %v669_v63, 2.5e-19  ;;  %v648_v13 = vpop.permute.xlu0 %647 }
 0x15d   :  { %v714_v8 = vmul.f32 %v1048_v5, %v495_v43  ;;  %v613_v11 = vpop.permute.xlu1 %612  ;;  %v677_v16 = vmul.f32 %v1388_v36, %v648_v13  ;;  %v950_v17 = vpop.f32.mrb[14].mxu1 }
 0x15e   :  { %1055 = vrsqrt.f32 %v685_v6  ;;  %v670_v14 = vmul.f32 %v1388_v36, %v613_v11  ;;  %v1414_v18 = vpop.f32.mrb[15].mxu1 }
 0x15f   :  { %1057 = vrsqrt.f32 %v691_v7  ;;  %730 = vst [vmem:[#allocation8 + $0x10] sm:$0xff] %v714_v8  ;;  %v693_v22 = vmax.f32 %v677_v16, 2.5e-19 }
 0x160   :  { %v1050_v19 = vpop.eup %1049  ;;  %v686_v20 = vmax.f32 %v670_v14, 2.5e-19  ;;  %v658_v25 = vpop.permute.xlu0 %657 }
 0x161   :  { %v715_v23 = vmul.f32 %v1050_v19, %v932_v42  ;;  %v618_v24 = vpop.permute.xlu1 %617  ;;  %v679_v27 = vmul.f32 %v1388_v36, %v658_v25 }
 0x162   :  { %1059 = vrsqrt.f32 %v686_v20  ;;  %v671_v26 = vmul.f32 %v1388_v36, %v618_v24 }
 0x163   :  { %731 = vst [vmem:[#allocation8 + $0x18] sm:$0xff] %v715_v23  ;;  %1061 = vrsqrt.f32 %v693_v22  ;;  %v695_v32 = vmax.f32 %v679_v27, 2.5e-19 }
 0x164   :  { %v1052_v28 = vpop.eup %1051  ;;  %v687_v31 = vmax.f32 %v671_v26, 2.5e-19 }
 0x165   :  { %v1054_v34 = vpop.eup %1053  ;;  %v716_v35 = vmul.f32 %v1052_v28, %v1394_v0  ;;  %v623_v37 = vpop.permute.xlu1 %622 }
 0x166   :  { %1063 = vrsqrt.f32 %v687_v31  ;;  %v672_v38 = vmul.f32 %v1388_v36, %v623_v37  ;;  %v721_v39 = vmul.f32 %v1054_v34, %v941_v33 }
 0x167   :  { %1065 = vrsqrt.f32 %v695_v32  ;;  %732 = vst [vmem:[#allocation8 + $0x20] sm:$0xff] %v716_v35 }
 0x168   :  { %v1056_v41 = vpop.eup %1055  ;;  %v688_v42 = vmax.f32 %v672_v38, 2.5e-19  ;;  %737 = vst [vmem:[#allocation8 + $0x48] sm:$0xff] %v721_v39 }
 0x169   :  { %v1058_v43 = vpop.eup %1057  ;;  %v717_v44 = vmul.f32 %v1056_v41, %v1392_v47  ;;  %v633_v45 = vpop.permute.xlu1 %632 }
 0x16a   :  { %1067 = vrsqrt.f32 %v688_v42  ;;  %v674_v46 = vmul.f32 %v1388_v36, %v633_v45  ;;  %v723_v2 = vmul.f32 %v1058_v43, %v944_v55 }
 0x16b   :  { %733 = vst [vmem:[#allocation8 + $0x28] sm:$0xff] %v717_v44 }
 0x16c   :  { %v1060_v0 = vpop.eup %1059  ;;  %v690_v9 = vmax.f32 %v674_v46, 2.5e-19  ;;  %739 = vst [vmem:[#allocation8 + $0x58] sm:$0xff] %v723_v2 }
 0x16d   :  { %v1062_v10 = vpop.eup %1061  ;;  %v718_v21 = vmul.f32 %v1060_v0, %v1399_v15  ;;  %v643_v29 = vpop.permute.xlu1 %642 }
 0x16e   :  { %1069 = vrsqrt.f32 %v690_v9  ;;  %v676_v30 = vmul.f32 %v1388_v36, %v643_v29  ;;  %v725_v33 = vmul.f32 %v1062_v10, %v947_v3 }
 0x16f   :  { %734 = vst [vmem:[#allocation8 + $0x30] sm:$0xff] %v718_v21 }
 0x170   :  { %v1064_v48 = vpop.eup %1063  ;;  %v692_v47 = vmax.f32 %v676_v30, 2.5e-19  ;;  %741 = vst [vmem:[#allocation8 + $0x68] sm:$0xff] %v725_v33 }
 0x171   :  { %v1066_v49 = vpop.eup %1065  ;;  %v719_v50 = vmul.f32 %v1064_v48, %v1397_v12  ;;  %v653_v51 = vpop.permute.xlu1 %652 }
 0x172   :  { %1071 = vrsqrt.f32 %v692_v47  ;;  %v727_v52 = vmul.f32 %v1066_v49, %v950_v17  ;;  %v678_v53 = vmul.f32 %v1388_v36, %v653_v51 }
 0x173   :  { %735 = vst [vmem:[#allocation8 + $0x38] sm:$0xff] %v719_v50 }
 0x174   :  { %v1068_v54 = vpop.eup %1067  ;;  %743 = vst [vmem:[#allocation8 + $0x78] sm:$0xff] %v727_v52  ;;  %v694_v15 = vmax.f32 %v678_v53, 2.5e-19 }
 0x175   :  { %v720_v55 = vmul.f32 %v1068_v54, %v1402_v40 }
 0x176   :  { %1073 = vrsqrt.f32 %v694_v15 }
 0x177   :  { %736 = vst [vmem:[#allocation8 + $0x40] sm:$0xff] %v720_v55 }
 0x178   :  { %v1070_v57 = vpop.eup %1069 }
 0x179   :  { %v722_v58 = vmul.f32 %v1070_v57, %v1406_v56 }
 0x17b   :  { %738 = vst [vmem:[#allocation8 + $0x50] sm:$0xff] %v722_v58 }
 0x17c   :  { %v1072_v59 = vpop.eup %1071 }
 0x17d   :  { %v724_v12 = vmul.f32 %v1072_v59, %v1410_v4 }
 0x17f   :  { %740 = vst [vmem:[#allocation8 + $0x60] sm:$0xff] %v724_v12 }
 0x180   :  { %v1074_v60 = vpop.eup %1073 }
 0x181   :  { %v726_v61 = vmul.f32 %v1074_v60, %v1414_v18 }
 0x183   :  { %742 = vst [vmem:[#allocation8 + $0x70] sm:$0xff] %v726_v61 }
 0x184   :  { %748 = vsyncadd [#allocation5], 1920  ;;  %s1156_s1 = smov [#allocation8]  }
 0x185   :  { %s749_s8 = sshll.u32 %s1156_s1, 4  ;;  %s750_s8 = int_to_ptr.vmem [resolvable:$true] %s749_s8 }
 0x186   :  { %s1119_s9 = scalar_lea.vmem %s750_s8, 128  ;;  %s1123_s10 = scalar_lea.vmem %s750_s8, 2048 }
 0x187   :  { %p1120_p2 = scmp.ne.s32.totalorder %s750_s8, %s1119_s9  ;;  %p1124_p3 = scmp.lt.s32.totalorder %s750_s8, %s750_s8 }
 0x188   :  { %p1125_p4 = scmp.lt.s32.totalorder %s1123_s10, %s1119_s9 }
 0x18a   :  { %p1126_p5 = por %p1125_p4, %p1124_p3 }
 0x18c   :  { %p1127_p6 = pnand %p1126_p5, %p1120_p2 }
 0x18e   :  { %1130 = shalt.err (!%p1127_p6)
}
 0x18f   :  { %s1131_s13 = scalar_lea.hbm %s1447_s2, 128 }
 0x190   :  { %p1132_p7 = scmp.ne.s32.totalorder %s1447_s2, %s1131_s13  ;;  %p1135_p8 = scmp.lt.u32.totalorder %s1131_s13, %s1447_s2 }
 0x192   :  { %p1137_p9 = pnand %p1135_p8, %p1132_p7 }
 0x194   :  { %1140 = shalt.err (!%p1137_p9)
}
 0x195   :  { %755 = dma.vmem_to_hbm [thread:$0]  %s750_s8, 128, %s1447_s2, [#allocation5], %s1148_s20, %s1148_s20, %s1149_s21  }
 0x196   :  { %1145 = dma.done.wait [#allocation5], 2048  }
 0x197   :  { %1146 = vsyncadd [#allocation5], 4294965248 }
 0x198   :  { %759 = vsyncpa [#allocation4], 1 }
 0x199   :  { %760 = vsyncpa [#allocation7], 1 }
 0x19a   :  { %761 = vsyncpa [#allocation5], 1 }

</bundles_post_ra>
